<compile_context>
chip_gen: v6e
topology: v6e:2x2x1
jax: 0.10.0
libtpu: 0.0.40
codegen_flags: <defaults>
</compile_context>

<pallas_src>
import functools

import jax
import jax.numpy as jnp
from jax.experimental import pallas as pl
from jax.experimental.pallas import tpu as pltpu


def attention_kernel(
    enc_ref,       # (Bblk, Ppad, E)   compute dtype (f32 or bf16)
    att2_ref,      # (Bblk, A)         f32, decoder projection + (b_enc + b_dec)
    w_enc_ref,     # (E, A)            compute dtype
    w_full_ref,    # (1, A)            f32, row form of the (A, 1) full_att weight
    weighted_ref,  # out: (Bblk, E)    f32
    alpha_ref,     # out: (Bblk, Ppad) f32, lane-dense
    *,
    num_valid_pixels,
):
    bblk, p_pad, e = enc_ref.shape
    a = w_enc_ref.shape[1]

    enc = enc_ref[...]                                              # (Bblk, Ppad, E)

    # att1 = encoder_att(encoder_out): one flat MXU matmul over Bblk*Ppad rows.
    # Ppad is a packed-sublane multiple, so both reshapes are layout no-ops.
    att1 = jnp.dot(
        enc.reshape(bblk * p_pad, e), w_enc_ref[...],
        preferred_element_type=jnp.float32,
    ).reshape(bblk, p_pad, a)                                       # (Bblk, Ppad, A) f32

    # att = relu(att1 + att2); att2 already carries b_enc + b_dec.
    att = jnp.maximum(att1 + att2_ref[...][:, None, :], 0.0)        # (Bblk, Ppad, A)

    # scores = full_att(att) minus the redundant b_full (softmax shift
    # invariance): VPU broadcast-mul by the (1, A) weight row + lane reduce
    # over A. Result is (Bblk, Ppad) with the pixel axis on lanes.
    scores = jnp.sum(att * w_full_ref[...][None, :, :], axis=-1)    # (Bblk, Ppad)

    # Mask padded pixels out of the softmax (static branch, only if padded).
    if num_valid_pixels < p_pad:
        lane = jax.lax.broadcasted_iota(jnp.int32, (bblk, p_pad), 1)
        scores = jnp.where(lane < num_valid_pixels, scores, -1e30)

    # softmax over pixels (lane axis); reciprocal on the EUP.
    m = jnp.max(scores, axis=-1, keepdims=True)                     # (Bblk, 1)
    ex = jnp.exp(scores - m)                                        # (Bblk, Ppad)
    denom = jnp.sum(ex, axis=-1, keepdims=True)                     # (Bblk, 1)
    alpha = ex * pl.reciprocal(denom, approx=True)                  # (Bblk, Ppad)

    # weighted[b] = sum_p alpha[b, p] * enc[b, p, :]  — VPU mul + sublane
    # reduce (cheaper than an M=1 batched MXU matmul, which is weight-load
    # bound and would keep the MXU busy for a single output row).
    weighted = jnp.sum(enc.astype(jnp.float32) * alpha[:, :, None], axis=1)

    weighted_ref[...] = weighted.astype(weighted_ref.dtype)
    alpha_ref[...] = alpha.astype(alpha_ref.dtype)


def _choose_batch_block(batch, target=8):
    """Batch block that is a multiple of 8 dividing `batch`, or the whole batch."""
    if batch <= target:
        return batch
    bblk = (target // 8) * 8
    while bblk >= 8:
        if batch % bblk == 0:
            return bblk
        bblk -= 8
    return batch  # fallback: whole batch in one grid step (always legal)


def _vmem_capacity_bytes():
    try:
        return int(pltpu.get_tpu_info().vmem_capacity_bytes)
    except Exception:
        return 64 << 20  # conservative: v7x per-TensorCore VMEM


def attention_forward(encoder_out, decoder_hidden, params, *,
                      batch_block=None, compute_dtype=jnp.float32):
    """encoder_out: (B, P, E) f32, decoder_hidden: (B, D) f32.

    compute_dtype controls only the MXU operands (encoder block + w_enc);
    all elementwise / softmax math stays f32.
    """
    B, P, E = encoder_out.shape
    D = decoder_hidden.shape[1]
    A = params["w_enc"].shape[1]

    itemsize = jnp.dtype(compute_dtype).itemsize
    # Pad the pixel axis to a packed-sublane multiple so the flat-matmul
    # reshape inside the kernel never crosses a (8,128)/(16,128) tile boundary.
    sub = 8 if itemsize >= 4 else 16
    P_pad = ((P + sub - 1) // sub) * sub
    enc = encoder_out
    if P_pad != P:
        enc = jnp.pad(enc, ((0, 0), (0, P_pad - P), (0, 0)))
    enc = enc.astype(compute_dtype)

    bblk = batch_block if batch_block is not None else _choose_batch_block(B)
    assert B % bblk == 0 and (bblk == B or bblk % 8 == 0), (B, bblk)

    w_enc = params["w_enc"].astype(compute_dtype)                   # (E, A)
    w_full_row = params["w_full"].reshape(1, A).astype(jnp.float32)
    # Decoder projection hoisted out of the kernel (tiny M=B matmul, done once
    # by XLA over the full batch) with b_enc folded into its bias.
    # b_full is intentionally dropped: softmax is shift-invariant.
    att2 = (
        decoder_hidden.astype(jnp.float32) @ params["w_dec"].astype(jnp.float32)
        + (params["b_enc"] + params["b_dec"])[None, :]
    ).astype(jnp.float32)                                           # (B, A)

    # VMEM budget estimate for this tiling (double-buffered streamed blocks,
    # single-buffered constant weights, f32 intermediates), with headroom.
    enc_blk = bblk * P_pad * E * itemsize
    att2_blk = bblk * A * 4
    w_bytes = E * A * itemsize + max(A, 128) * 8 * 4
    out_bytes = (bblk * E + bblk * P_pad) * 4
    interm = 2 * bblk * P_pad * A * 4 + 2 * bblk * P_pad * E * 4
    needed = 2 * enc_blk + 2 * att2_blk + w_bytes + 2 * out_bytes + interm
    cap = _vmem_capacity_bytes()
    vmem_limit = int(min(max(int(needed * 1.3) + (4 << 20), 32 << 20),
                         cap - (4 << 20)))

    kernel = functools.partial(attention_kernel, num_valid_pixels=P)

    weighted, alpha_pad = pl.pallas_call(
        kernel,
        out_shape=(
            jax.ShapeDtypeStruct((B, E), jnp.float32),
            jax.ShapeDtypeStruct((B, P_pad), jnp.float32),
        ),
        grid_spec=pltpu.PrefetchScalarGridSpec(
            num_scalar_prefetch=0,
            grid=(B // bblk,),
            in_specs=[
                pl.BlockSpec((bblk, P_pad, E), lambda i: (i, 0, 0)),   # enc block
                pl.BlockSpec((bblk, A), lambda i: (i, 0)),             # att2 block
                pl.BlockSpec((E, A), lambda i: (0, 0),
                             pipeline_mode=pl.Buffered(1)),            # w_enc (const)
                pl.BlockSpec((1, A), lambda i: (0, 0),
                             pipeline_mode=pl.Buffered(1)),            # w_full (const)
            ],
            out_specs=[
                pl.BlockSpec((bblk, E), lambda i: (i, 0)),             # weighted
                pl.BlockSpec((bblk, P_pad), lambda i: (i, 0)),         # alpha
            ],
        ),
        compiler_params=pltpu.CompilerParams(
            dimension_semantics=("parallel",),
            vmem_limit_bytes=vmem_limit,
        ),
    )(enc, att2, w_enc, w_full_row)

    alpha = alpha_pad[:, :P] if P_pad != P else alpha_pad
    return weighted, alpha


def attention_reference(encoder_out, decoder_hidden, params):
    """Pure-JAX reference mirroring the PyTorch forward (including b_full)."""
    att1 = encoder_out @ params["w_enc"] + params["b_enc"]               # (B,P,A)
    att2 = decoder_hidden @ params["w_dec"] + params["b_dec"]            # (B,A)
    att = jax.nn.relu(att1 + att2[:, None, :])                           # (B,P,A)
    scores = (att @ params["w_full"])[..., 0] + params["b_full"][0]      # (B,P)
    alpha = jax.nn.softmax(scores, axis=1)                               # (B,P)
    weighted = jnp.sum(encoder_out * alpha[:, :, None], axis=1)          # (B,E)
    return weighted, alpha


if __name__ == "__main__":
    # Small shapes consistent with the module. P is deliberately NOT a
    # multiple of 8 to exercise the host-side padding + in-kernel mask path;
    # B=16 with Bblk=8 gives a 2-step grid (both v7x TensorCores busy).
    B, P = 16, 12           # batch, num_pixels
    E, D, A = 32, 16, 32    # encoder_dim, decoder_dim, attention_dim

    key = jax.random.PRNGKey(0)
    k_enc, k_dec, k_we, k_be, k_wd, k_bd, k_wf, k_bf = jax.random.split(key, 8)

    encoder_out = jax.random.normal(k_enc, (B, P, E), dtype=jnp.float32)
    decoder_hidden = jax.random.normal(k_dec, (B, D), dtype=jnp.float32)

    params = {
        "w_enc": jax.random.normal(k_we, (E, A), dtype=jnp.float32) * 0.1,
        "b_enc": jax.random.normal(k_be, (A,), dtype=jnp.float32) * 0.1,
        "w_dec": jax.random.normal(k_wd, (D, A), dtype=jnp.float32) * 0.1,
        "b_dec": jax.random.normal(k_bd, (A,), dtype=jnp.float32) * 0.1,
        "w_full": jax.random.normal(k_wf, (A, 1), dtype=jnp.float32) * 0.1,
        "b_full": jax.random.normal(k_bf, (1,), dtype=jnp.float32) * 0.1,
    }

    w_ref, a_ref = attention_reference(encoder_out, decoder_hidden, params)

    # f32 MXU-operand path (matches the PyTorch f32 semantics; approx
    # reciprocal in the softmax normalization -> slightly loosened tolerance).
    weighted, alpha = attention_forward(encoder_out, decoder_hidden, params)
    jax.block_until_ready((weighted, alpha))
    assert weighted.shape == (B, E) and alpha.shape == (B, P)
    assert jnp.allclose(weighted, w_ref, atol=2e-3, rtol=2e-3)
    assert jnp.allclose(alpha, a_ref, atol=2e-3, rtol=2e-3)

    # bf16 MXU-operand path (the perf configuration for realistic sizes:
    # halves enc HBM traffic / VMEM and uses native bf16 MXU passes).
    weighted_bf, alpha_bf = attention_forward(
        encoder_out, decoder_hidden, params, compute_dtype=jnp.bfloat16)
    jax.block_until_ready((weighted_bf, alpha_bf))
    assert weighted_bf.shape == (B, E) and alpha_bf.shape == (B, P)
    assert jnp.allclose(weighted_bf, w_ref, atol=1e-1, rtol=1e-1)
    assert jnp.allclose(alpha_bf, a_ref, atol=1e-1, rtol=1e-1)

    print("KERNEL_OK")
</pallas_src>

<mosaic_0001>
module attributes {stable_mosaic.version = 11 : i64} {
  func.func @attention_kernel(%arg0: i32, %arg1: memref<8x16x32xf32, #tpu.memory_space<vmem>>, %arg2: memref<8x32xf32, #tpu.memory_space<vmem>>, %arg3: memref<32x32xf32, #tpu.memory_space<vmem>>, %arg4: memref<1x32xf32, #tpu.memory_space<vmem>>, %arg5: memref<8x32xf32, #tpu.memory_space<vmem>>, %arg6: memref<8x16xf32, #tpu.memory_space<vmem>>) attributes {dimension_semantics = [#tpu.dimension_semantics<parallel>], iteration_bounds = array<i64: 2>, scalar_prefetch = 0 : i64, scratch_operands = 0 : i64, tpu.core_type = #tpu.core_type<tc>, window_params = [{transform_indices = @transform_0, window_bounds = array<i64: 8, 16, 32>}, {transform_indices = @transform_1, window_bounds = array<i64: 8, 32>}, {pipeline_mode = #tpu.pipeline_mode<synchronous>, transform_indices = @transform_2, window_bounds = array<i64: 32, 32>}, {pipeline_mode = #tpu.pipeline_mode<synchronous>, transform_indices = @transform_3, window_bounds = array<i64: 1, 32>}, {transform_indices = @transform_4, window_bounds = array<i64: 8, 32>}, {transform_indices = @transform_5, window_bounds = array<i64: 8, 16>}]} {
    %c0 = arith.constant 0 : index
    %c0_0 = arith.constant 0 : index
    %c0_1 = arith.constant 0 : index
    %0 = vector.load %arg1[%c0, %c0_0, %c0_1] : memref<8x16x32xf32, #tpu.memory_space<vmem>>, vector<8x16x32xf32>
    %1 = vector.shape_cast %0 : vector<8x16x32xf32> to vector<128x32xf32>
    %c0_2 = arith.constant 0 : index
    %c0_3 = arith.constant 0 : index
    %2 = vector.load %arg3[%c0_2, %c0_3] : memref<32x32xf32, #tpu.memory_space<vmem>>, vector<32x32xf32>
    %cst = arith.constant dense<0.000000e+00> : vector<128x32xf32>
    %3 = tpu.matmul %1, %2, %cst {dimension_numbers = #tpu.dot_dimension_numbers<[1], [0], [0], [1], [0, 0, 1, 1], [], []>} : vector<128x32xf32>, vector<32x32xf32>, vector<128x32xf32> -> vector<128x32xf32>
    %4 = vector.shape_cast %3 : vector<128x32xf32> to vector<8x16x32xf32>
    %c0_4 = arith.constant 0 : index
    %c0_5 = arith.constant 0 : index
    %5 = vector.load %arg2[%c0_4, %c0_5] : memref<8x32xf32, #tpu.memory_space<vmem>>, vector<8x32xf32>
    %6 = vector.shape_cast %5 : vector<8x32xf32> to vector<8x1x32xf32>
    %7 = vector.broadcast %6 : vector<8x1x32xf32> to vector<8x16x32xf32>
    %8 = arith.addf %4, %7 : vector<8x16x32xf32>
    %cst_6 = arith.constant 0.000000e+00 : f32
    %9 = vector.broadcast %cst_6 : f32 to vector<8x16x32xf32>
    %10 = arith.maximumf %8, %9 : vector<8x16x32xf32>
    %c0_7 = arith.constant 0 : index
    %c0_8 = arith.constant 0 : index
    %11 = vector.load %arg4[%c0_7, %c0_8] : memref<1x32xf32, #tpu.memory_space<vmem>>, vector<1x32xf32>
    %12 = vector.shape_cast %11 : vector<1x32xf32> to vector<1x1x32xf32>
    %13 = vector.broadcast %12 : vector<1x1x32xf32> to vector<8x16x32xf32>
    %14 = arith.mulf %10, %13 : vector<8x16x32xf32>
    %cst_9 = arith.constant dense<0.000000e+00> : vector<8x16xf32>
    %15 = vector.multi_reduction <add>, %14, %cst_9 [2] : vector<8x16x32xf32> to vector<8x16xf32>
    %16 = tpu.iota {dimensions = array<i32: 1>} : vector<8x16xi32>
    %c12_i32 = arith.constant 12 : i32
    %17 = vector.broadcast %c12_i32 : i32 to vector<8x16xi32>
    %18 = arith.cmpi slt, %16, %17 : vector<8x16xi32>
    %cst_10 = arith.constant -1.000000e+30 : f32
    %19 = vector.broadcast %cst_10 : f32 to vector<8x16xf32>
    %20 = arith.select %18, %15, %19 : vector<8x16xi1>, vector<8x16xf32>
    %cst_11 = arith.constant dense<0xFF800000> : vector<8xf32>
    %21 = vector.multi_reduction <maximumf>, %20, %cst_11 [1] : vector<8x16xf32> to vector<8xf32>
    %22 = vector.shape_cast %21 : vector<8xf32> to vector<8x1xf32>
    %23 = vector.broadcast %22 : vector<8x1xf32> to vector<8x16xf32>
    %24 = arith.subf %20, %23 : vector<8x16xf32>
    %25 = math.exp %24 : vector<8x16xf32>
    %cst_12 = arith.constant dense<0.000000e+00> : vector<8xf32>
    %26 = vector.multi_reduction <add>, %25, %cst_12 [1] : vector<8x16xf32> to vector<8xf32>
    %27 = vector.shape_cast %26 : vector<8xf32> to vector<8x1xf32>
    %28 = tpu.reciprocal %27 {approx = true} : vector<8x1xf32> -> vector<8x1xf32>
    %29 = vector.broadcast %28 : vector<8x1xf32> to vector<8x16xf32>
    %30 = arith.mulf %25, %29 : vector<8x16xf32>
    %31 = vector.shape_cast %30 : vector<8x16xf32> to vector<8x16x1xf32>
    %32 = vector.broadcast %31 : vector<8x16x1xf32> to vector<8x16x32xf32>
    %33 = arith.mulf %0, %32 : vector<8x16x32xf32>
    %cst_13 = arith.constant dense<0.000000e+00> : vector<8x32xf32>
    %34 = vector.multi_reduction <add>, %33, %cst_13 [1] : vector<8x16x32xf32> to vector<8x32xf32>
    %c0_14 = arith.constant 0 : index
    %c0_15 = arith.constant 0 : index
    %35 = vector.load %arg5[%c0_14, %c0_15] : memref<8x32xf32, #tpu.memory_space<vmem>>, vector<8x32xf32>
    tpu.vector_store %arg5[%c0_14, %c0_15], %34 {strides = array<i32>} : memref<8x32xf32, #tpu.memory_space<vmem>>, vector<8x32xf32>,
    %c0_16 = arith.constant 0 : index
    %c0_17 = arith.constant 0 : index
    %36 = vector.load %arg6[%c0_16, %c0_17] : memref<8x16xf32, #tpu.memory_space<vmem>>, vector<8x16xf32>
    tpu.vector_store %arg6[%c0_16, %c0_17], %30 {strides = array<i32>} : memref<8x16xf32, #tpu.memory_space<vmem>>, vector<8x16xf32>,
    return
  }
  func.func @transform_0(%arg0: i32) -> (i32, i32, i32) {
    %c0_i32 = arith.constant 0 : i32
    %c0_i32_0 = arith.constant 0 : i32
    %c0_i32_1 = arith.constant 0 : i32
    return %arg0, %c0_i32, %c0_i32_0 : i32, i32, i32
  }
  func.func @transform_1(%arg0: i32) -> (i32, i32) {
    %c0_i32 = arith.constant 0 : i32
    %c0_i32_0 = arith.constant 0 : i32
    return %arg0, %c0_i32 : i32, i32
  }
  func.func @transform_2(%arg0: i32) -> (i32, i32) {
    %c0_i32 = arith.constant 0 : i32
    %c0_i32_0 = arith.constant 0 : i32
    %c0_i32_1 = arith.constant 0 : i32
    return %c0_i32, %c0_i32_0 : i32, i32
  }
  func.func @transform_3(%arg0: i32) -> (i32, i32) {
    %c0_i32 = arith.constant 0 : i32
    %c0_i32_0 = arith.constant 0 : i32
    %c0_i32_1 = arith.constant 0 : i32
    return %c0_i32, %c0_i32_0 : i32, i32
  }
  func.func @transform_4(%arg0: i32) -> (i32, i32) {
    %c0_i32 = arith.constant 0 : i32
    %c0_i32_0 = arith.constant 0 : i32
    return %arg0, %c0_i32 : i32, i32
  }
  func.func @transform_5(%arg0: i32) -> (i32, i32) {
    %c0_i32 = arith.constant 0 : i32
    %c0_i32_0 = arith.constant 0 : i32
    return %arg0, %c0_i32 : i32, i32
  }
}

</mosaic_0001>

<bundles_post_ra>
// kernel: tpu_custom_call.1
= control target key start
LH: loop header
LB: loop body
LE: loop exit
PB: predicated region body
PF: predicated region fallthrough
CT: control target
= control target key end

     0   :  { %s2053_s0 = inlined_call_operand.hbm [shape: f32[16,16,32], index: 0, kind: input, shape index: {}]   ;;  %s2054_s1 = inlined_call_operand.hbm [shape: f32[16,32], index: 1, kind: input, shape index: {}]   ;;  %s2055_s2 = inlined_call_operand.hbm [shape: f32[32,32], index: 2, kind: input, shape index: {}]   ;;  %s2056_s3 = inlined_call_operand.vmem [shape: f32[1,32], index: 3, kind: input, shape index: {}]   ;;  %s2057_s4 = inlined_call_operand.hbm [shape: f32[16,32], index: 4, kind: output, shape index: {0}]   ;;  %s2058_s5 = inlined_call_operand.hbm [shape: f32[16,16], index: 5, kind: output, shape index: {1}]  }
   0x1   :  { %2063 = sst [smem:[#allocation17_spill]] %s2053_s0 }
   0x2   :  { %2064 = sst [smem:[#allocation18_spill]] %s2055_s2 }
   0x3   :  { %11 = vsyncpa [#allocation3], 0 }
   0x4   :  { %13 = vsyncpa [#allocation3 + $0x1], 0 }
   0x5   :  { %14 = vsyncpa [#allocation6], 0 }
   0x6   :  { %16 = vsyncpa [#allocation6 + $0x1], 0 }
   0x7   :  { %17 = vsyncpa [#allocation4], 0 }
   0x8   :  { %19 = vsyncpa [#allocation4 + $0x1], 0 }
   0x9   :  { %20 = vsyncpa [#allocation10], 0 }
   0xa   :  { %22 = vsyncpa [#allocation10 + $0x1], 0  ;;  %s1596_s18 = smov 0   ;;  %s1598_s19 = smov 0  }
   0xb   :  { %s1600_s20 = smov 0   ;;  %s1602_s21 = smov 0  }
   0xc LB: > { %s1617_s22 = sadd.s32 4294967295, %s1556_s21   ;;  %s1196_s23 = sadd.s32 4294967294, %s1556_s21   ;;  %s1556_s21 = sphi %s1602_s21, %s2088_s21   ;;  %s1552_s20 = sphi %s1600_s20, %s2087_s20   ;;  %s1548_s19 = sphi %s1598_s19, %s2086_s19   ;;  %s1544_s18 = sphi %s1596_s18, %s2085_s18  }
   0xd   : > { %p48_p0 = scmp.ne.s32.totalorder %s1548_s19, %s1544_s18  ;;  %p2059_p1 = scmp.eq.s32.totalorder %s1617_s22, 0 }
   0xe   : > { %p146_p3 = scmp.eq.s32.totalorder %s1196_s23, 1  ;;  %p1197_p5 = scmp.ge.s32.totalorder %s1556_s21, 1 }
   0xf   : > { %p1626_p4 = por %p2059_p1, %p48_p0  ;;  %p179_p7 = scmp.lt.s32.totalorder %s1556_s21, 3 }
  0x10   : > { %p1631_p6 = por %p146_p3, %p48_p0  ;;  %s1558_s27 = smov [#allocation7]  }
  0x11   : > { %s2065_s24 = scalar_select %p1626_p4, 1, 0 }
  0x12   : > { %s2066_s25 = scalar_select %p1631_p6, 1, 0 }
  0x13   : > { %p1636_p8 = pnand %p1197_p5, %p179_p7  ;;  %s191_s28 = sshll.u32 %s1558_s27, 4  ;;  %s192_s28 = int_to_ptr.vmem [resolvable:$true] %s191_s28 }
  0x14   : > { %s1650_s30 = sadd.s32 1, %s1556_s21   ;;  %s35_s6 = sadd.s32 1, %s1552_s20 }
  0x15   : > { %s2067_s26 = scalar_select %p1636_p8, 1, 0 }
  0x16   : > { %p1309_p9 = pneg %p1636_p8  ;;  %s32_s7 = ssub.s32 %s1556_s21, %s1650_s30 }
  0x17   : > { %s1383_s8 = scalar_lea.vmem %s192_s28, 512  ;;  %p1391_p5 = scmp.lt.s32.totalorder %s192_s28, %s192_s28 }
  0x18   : > { %p1645_p11 = pnand %p1309_p9, %p2059_p1  ;;  %p1384_p13 = scmp.ne.s32.totalorder %s192_s28, %s1383_s8 }
  0x19   : > { %p1392_p7 = scmp.lt.s32.totalorder %s1383_s8, %s1383_s8 }
  0x1a   : > { %p1374_p12 = pneg %p1645_p11 }
  0x1b   : > { %p1393_p10 = por %p1392_p7, %p1391_p5 }
  0x1c   : > { %p1386_p0 = pnand %p1384_p13, %p1374_p12 }
  0x1e   : > { %p1387_p3 = pneg %p1386_p0 }
  0x20   : > { %p1394_p2 = pnand %p1393_p10, %p1387_p3 }
  0x22   : > { %1397 = shalt.err (!%p1394_p2)
}
  0x23   : > { %s1559_s9 = smov 128   ;;  %s1560_s10 = smov 8  }
  0x24   : > { %s2069_s2 = sld [smem:[#allocation18_spill]]  ;;  %p33_p2 = scmp.eq.s32.totalorder %s32_s7, 0 }
  0x25   : > { %p42_p9 = scmp.ne.s32.totalorder %s1552_s20, %s1548_s19  ;;  %p43_p10 = scmp.eq.s32.totalorder %s1556_s21, 0 }
  0x26   : > { %p1328_p12 = scmp.lt.s32.totalorder %s1556_s21, 2  ;;  %p2071_p0 = scmp.eq.s32.totalorder %s1617_s22, 1 }
  0x27   : > { %s1670_s13 = scalar_select %p33_p2, %s1552_s20, %s35_s6  }
  0x28   : > { %p44_p13 = por %p43_p10, %p42_p9  ;;  %p1674_p3 = por %p2071_p0, %p42_p9 }
  0x29   : > { %2070 = sst [smem:[#allocation16_spill]] %s1670_s13  ;;  %s1679_s15 = sand.u32 1, %s1552_s20  }
  0x2a   : > { %1312 = dma.hbm_to_vmem [thread:$0]  (!%p1645_p11), %s2069_s2, 512, %s192_s28, [#allocation6], %s1559_s9, %s1559_s9, %s1560_s10  }
  0x2b   : > { %s2072_s14 = scalar_select %p1674_p3, 1, 0 }
  0x2c   : > { %s1236_s16 = sshll.u32 %s1556_s21, 11  ;;  %s1200_s17 = sshll.u32 %s1679_s15, 7 }
  0x2d   : > { %s2073_s0 = sld [smem:[#allocation17_spill]]  ;;  %s212_s29 = scalar_lea.vmem [#allocation2], %s1200_s17 }
  0x2e   : > { %s220_s6 = sshll.u32 %s212_s29, 4  ;;  %p1688_p11 = pnand %p1328_p12, %p44_p13  ;;  %s1692_s6 = int_to_ptr.vmem [resolvable:$true] %s220_s6 }
  0x30   : > { %p1400_p7 = pneg %p1688_p11 }
  0x33   : > { %s1686_s28 = scalar_lea.hbm %s2073_s0, %s1236_s16  ;;  %s1403_s23 = scalar_lea.hbm %s2073_s0, 4096 }
  0x34   : > { %s1398_s12 = scalar_lea.hbm %s1686_s28, 2048  ;;  %p1404_p10 = scmp.lt.s32.totalorder %s1686_s28, %s2073_s0 }
  0x35   : > { %p1399_p5 = scmp.ne.s32.totalorder %s1686_s28, %s1398_s12  ;;  %p1405_p12 = scmp.lt.s32.totalorder %s1403_s23, %s1398_s12 }
  0x37   : > { %p1401_p2 = pnand %p1400_p7, %p1399_p5  ;;  %p1406_p13 = por %p1405_p12, %p1404_p10 }
  0x39   : > { %p1402_p9 = pneg %p1401_p2 }
  0x3b   : > { %p1407_p0 = pnand %p1406_p13, %p1402_p9 }
  0x3d   : > { %1410 = shalt.err (!%p1407_p0)
}
  0x3e   : > { %s1411_s8 = scalar_lea.vmem %s1692_s6, 2048  ;;  %s1561_s16 = smov [#allocation2]  }
  0x3f   : > { %p1412_p1 = scmp.ne.s32.totalorder %s1692_s6, %s1411_s8  ;;  %s1416_s17 = sshll.u32 %s1561_s16, 4  ;;  %s1417_s17 = int_to_ptr.vmem [resolvable:$false] %s1416_s17 }
  0x40   : > { %s1418_s11 = scalar_lea.vmem %s1417_s17, 4096  ;;  %p1419_p6 = scmp.lt.s32.totalorder %s1692_s6, %s1417_s17 }
  0x41   : > { %p1414_p5 = pnand %p1412_p1, %p1400_p7  ;;  %p1420_p3 = scmp.lt.s32.totalorder %s1418_s11, %s1411_s8 }
  0x43   : > { %p1415_p2 = pneg %p1414_p5  ;;  %p1421_p4 = por %p1420_p3, %p1419_p6 }
  0x45   : > { %p1422_p10 = pnand %p1421_p4, %p1415_p2 }
  0x47   : > { %1425 = shalt.err (!%p1422_p10)
}
  0x48   : > { %s2075_s12 = scalar_lea.sflag [#allocation3], %s1679_s15  ;;  %s1204_s23 = sshll.u32 %s1679_s15, 3 }
  0x49   : > { %1316 = dma.hbm_to_vmem [thread:$0]  (!%p1688_p11), %s1686_s28, 2048, %s1692_s6, %s2075_s12, %s1559_s9, %s1559_s9, %s1560_s10  }
  0x4a   : > { %s1205_s27 = sshll.u32 %s1556_s21, 7  ;;  %s234_s16 = scalar_lea.vmem [#allocation5], %s1204_s23 }
  0x4b   : > { %s1730_s29 = scalar_lea.hbm %s2054_s1, %s1205_s27  ;;  %s241_s17 = sshll.u32 %s234_s16, 4  ;;  %s242_s17 = int_to_ptr.vmem [resolvable:$true] %s241_s17 }
  0x4c   : > { %s2076_s0 = sand.u32 1, %s1556_s21   ;;  %s1426_s13 = scalar_lea.hbm %s1730_s29, 128 }
  0x4d   : > { %s231_s2 = scalar_lea.sflag [#allocation6], %s2076_s0  ;;  %p1427_p1 = scmp.ne.s32.totalorder %s1730_s29, %s1426_s13 }
  0x4e   : > { %s1431_s15 = scalar_lea.hbm %s2054_s1, 256  ;;  %p1432_p3 = scmp.lt.s32.totalorder %s1730_s29, %s2054_s1 }
  0x4f   : > { %p1429_p4 = pnand %p1427_p1, %p1400_p7  ;;  %p1433_p9 = scmp.lt.s32.totalorder %s1431_s15, %s1426_s13 }
  0x51   : > { %p1430_p6 = pneg %p1429_p4  ;;  %p1434_p12 = por %p1433_p9, %p1432_p3 }
  0x53   : > { %p1435_p13 = pnand %p1434_p12, %p1430_p6 }
  0x55   : > { %1438 = shalt.err (!%p1435_p13)
}
  0x56   : > { %s1439_s12 = scalar_lea.vmem %s242_s17, 128  ;;  %s1562_s0 = smov [#allocation5]  }
  0x57   : > { %p1440_p0 = scmp.ne.s32.totalorder %s242_s17, %s1439_s12  ;;  %s1444_s23 = sshll.u32 %s1562_s0, 4  ;;  %s1445_s23 = int_to_ptr.vmem [resolvable:$false] %s1444_s23 }
  0x58   : > { %s1446_s27 = scalar_lea.vmem %s1445_s23, 256  ;;  %p1447_p10 = scmp.lt.s32.totalorder %s242_s17, %s1445_s23 }
  0x59   : > { %p1442_p5 = pnand %p1440_p0, %p1400_p7  ;;  %p1448_p1 = scmp.lt.s32.totalorder %s1446_s27, %s1439_s12 }
  0x5b   : > { %p1443_p2 = pneg %p1442_p5  ;;  %p1449_p4 = por %p1448_p1, %p1447_p10 }
  0x5d   : > { %p1450_p8 = pnand %p1449_p4, %p1443_p2 }
  0x5f   : > { %1453 = shalt.err (!%p1450_p8)
}
  0x60   : > { %1319 = dma.hbm_to_vmem [thread:$0]  (!%p1688_p11), %s1730_s29, 128, %s242_s17, %s231_s2  }
  0x61   : > { %p2077_p6 = scmp.ne.s32.totalorder %s2067_s26, 0 }
  0x62   : > { %s1755_s13 = sand.u32 (!%p2077_p6), 1, %s1548_s19   ;;  %p2078_p7 = scmp.ne.s32.totalorder (!%p2077_p6), %s2065_s24, 0 }
  0x63   : > { %250 = sbr.rel (%p2077_p6) target bundleno = 985 (0x3d9), region = 36  ;;  %s1207_s8 = sshll.u32 (!%p2077_p6), %s1755_s13, 7 }
  0x64   : > { %s253_s11 = scalar_lea.sflag (!%p2077_p6), [#allocation3], %s1755_s13  ;;  %s1759_s16 = scalar_lea.vmem (!%p2077_p6), [#allocation2], %s1207_s8 }
  0x68   : > { %1523 = dma.done.wait (%p2078_p7), %s253_s11, 2048  }
  0x69   : > { %1525 = vsyncadd (%p2078_p7), %s253_s11, 4294965248  ;;  %s261_s2 = sand.u32 1, %s1617_s22   ;;  %s1767_s26 = sshll.u32 %s1755_s13, 3 }
  0x6a   : > { %s262_s7 = scalar_lea.sflag [#allocation6], %s261_s2  ;;  %s265_s29 = scalar_lea.vmem [#allocation5], %s1767_s26 }
  0x6b   : > { %1527 = dma.done.wait (%p2078_p7), %s262_s7, 128  }
  0x6c   : > { %1529 = vsyncadd (%p2078_p7), %s262_s7, 4294967168  ;;  %p2079_p8 = scmp.eq.s32.totalorder %s1617_s22, 0 }
  0x6e   : > { %1531 = dma.done.wait (%p2079_p8), [#allocation6], 512   ;;  %p2080_p11 = pmov %p2079_p8 }
  0x6f   : > { %v326_v0 = vld [vmem:[#allocation7 + $0x18] sm:$0xff]  ;;  %v325_v1 = vld [vmem:[#allocation7 + $0x10] sm:$0xff]  ;;  %v324_v2 = vld [vmem:[#allocation7 + $0x8] sm:$0xff]  ;;  %vm327_vm0 = vcmask 261120   ;;  %v1563_v20 = vmov 1966171168   ;;  %v527_v22 = vlaneseq }
  0x70   : > { %1533 = vsyncadd (%p2080_p11), [#allocation6], 4294966784  ;;  %1257 = vmatprep.subr.mxu0 %v326_v0  ;;  %1289 = vmatprep.subr.mxu1 %v326_v0  ;;  %v323_v3 = vld [vmem:[#allocation7] sm:$0xff]  ;;  %v1779_v4 = vld [vmem:[%s1759_s16] sm:$0xff]  ;;  %v525_v21 = vunpack.c.l.s4 %v1563_v20  ;;  %vm743_vm1 = vcmask 130112   ;;  %vm808_vm2 = vcmask 1041409  }
  0x71   : > { %1258 = vmatpush3.msra.mxu0 %v326_v0  ;;  %1293 = vmatpush3.msra.mxu1 %v326_v0  ;;  %v1782_v5 = vld [vmem:[%s1759_s16 + $0x40] sm:$0xff]  ;;  %v1785_v6 = vld [vmem:[%s1759_s16 + $0x8] sm:$0xff]  ;;  %v1791_v8 = vld [vmem:[%s1759_s16 + $0x10] sm:$0xff]  ;;  %v1859_v24 = vshrl.u32 %v527_v22, 7  ;;  %vm810_vm3 = vcmask 1042434   ;;  %vm812_vm4 = vcmask 1043459  }
  0x72   : > { %1259 = vmatprep.subr.mxu0 %v325_v1  ;;  %1290 = vmatprep.subr.mxu1 %v325_v1  ;;  %v1788_v7 = vld [vmem:[%s1759_s16 + $0x48] sm:$0xff]  ;;  %v1794_v9 = vld [vmem:[%s1759_s16 + $0x50] sm:$0xff]  ;;  %v1807_v10 = vld [vmem:[%s1759_s16 + $0x18] sm:$0xff]  ;;  %v526_v23 = vunpack.c.0.s8 %v525_v21  ;;  %vm814_vm5 = vcmask 1044484   ;;  %vm816_vm6 = vcmask 1045509   ;;  %vm818_vm7 = vcmask 1046534  }
  0x73   : > { %1260 = vmatpush3.msra.mxu0 %v325_v1  ;;  %1294 = vmatpush3.msra.mxu1 %v325_v1  ;;  %v1812_v11 = vld [vmem:[%s1759_s16 + $0x58] sm:$0xff]  ;;  %v1815_v12 = vld [vmem:[%s1759_s16 + $0x20] sm:$0xff]  ;;  %v1827_v14 = vld [vmem:[%s1759_s16 + $0x28] sm:$0xff]  ;;  %v1865_v31 = vsub.s32 0, %v1859_v24  ;;  %vm820_vm8 = vcmask 1047559   ;;  %vm824_vm10 = vcmask 130048  }
  0x74   : > { %1261 = vmatprep.subr.mxu0 %v324_v2  ;;  %1291 = vmatprep.subr.mxu1 %v324_v2  ;;  %v1818_v13 = vld [vmem:[%s1759_s16 + $0x60] sm:$0xff]  ;;  %v1832_v15 = vld [vmem:[%s1759_s16 + $0x68] sm:$0xff]  ;;  %v1835_v16 = vld [vmem:[%s1759_s16 + $0x30] sm:$0xff]  ;;  %v529_v26 = vsub.s32 %v526_v23, %v1859_v24  ;;  %s305_s9 = scalar_lea.vmem [#allocation9], %s1767_s26  ;;  %s1231_s10 = sshll.u32 %s1617_s22, 7 }
  0x75   : > { %1262 = vmatpush3.msra.mxu0 %v324_v2  ;;  %1295 = vmatpush3.msra.mxu1 %v324_v2  ;;  %v1838_v17 = vld [vmem:[%s1759_s16 + $0x70] sm:$0xff]  ;;  %v1847_v18 = vld [vmem:[%s1759_s16 + $0x38] sm:$0xff]  ;;  %v521_v25 = vld [vmem:[%s265_s29] sm:$0xff]  ;;  %s1060_s6 = scalar_lea.hbm %s2058_s5, %s1231_s10  ;;  %s1062_s12 = sshll.u32 %s305_s9, 4  ;;  %s1063_s12 = int_to_ptr.vmem [resolvable:$true] %s1062_s12 }
  0x76   : > { %1263 = vmatprep.subr.mxu0 %v323_v3  ;;  %1292 = vmatprep.subr.mxu1 %v323_v3  ;;  %v1852_v19 = vld [vmem:[%s1759_s16 + $0x78] sm:$0xff]  ;;  %v523_v27 = vcombine.high %v521_v25, %v521_v25  ;;  %v530_v28 = vrot.slane %v521_v25, %v529_v26  ;;  %v1877_v52 = vld [vmem:[%s2056_s3] ss:$0 sm:$0xff]  ;;  %s1036_s0 = scalar_lea.sflag [#allocation10], %s1755_s13  ;;  %s1454_s23 = scalar_lea.vmem %s1063_s12, 128 }
  0x77   : > { %1264 = vmatpush3.msra.mxu0 %v323_v3  ;;  %1296 = vmatpush3.msra.mxu1 %v323_v3  ;;  %p1455_p3 = scmp.ne.s32.totalorder %s1063_s12, %s1454_s23  ;;  %p2081_p9 = scmp.ne.s32.totalorder %s2072_s14, 0 }
  0x78   : > { %1265 = vmatprep.mubr.msk.f32.mxu0 %vm327_vm0, %v1779_v4  ;;  %1277 = vmatprep.mubr.msk.f32.mxu1 %vm327_vm0, %v1782_v5  ;;  %v537_v29 = vrot.slane %v523_v27, %v529_v26  ;;  %v546_v30 = vrot.slane %v530_v28, %v529_v26  ;;  %v538_v33 = vcombine.high %v530_v28, %v530_v28  ;;  %s1564_s27 = smov [#allocation9]  }
  0x79   : > { %1266 = vmatmul.mubr.msk.f32.vlgmr.msra.gmra.mxu0 %vm327_vm0, %v1785_v6  ;;  %1278 = vmatmul.mubr.msk.f32.vlgmr.msra.gmra.mxu1 %vm327_vm0, %v1788_v7  ;;  %p1456_p12 = pnand %p1455_p3, %p2081_p9  ;;  %s1458_s8 = sshll.u32 %s1564_s27, 4  ;;  %s1459_s8 = int_to_ptr.vmem [resolvable:$false] %s1458_s8 }
  0x7a   : > { %1268 = vmatprep.mubr.msk.f32.mxu0 %vm327_vm0, %v1791_v8  ;;  %1280 = vmatprep.mubr.msk.f32.mxu1 %vm327_vm0, %v1794_v9  ;;  %v553_v32 = vrot.slane %v537_v29, %v529_v26  ;;  %v539_v34 = vcombine.high %v537_v29, %v537_v29  ;;  %v575_v35 = vrot.slane %v546_v30, %v1865_v31  ;;  %s1460_s11 = scalar_lea.vmem %s1459_s8, 256  ;;  %p1461_p0 = scmp.lt.s32.totalorder %s1063_s12, %s1459_s8 }
  0x7b   : > { %v560_v37 = vrot.slane %v538_v33, %v529_v26  ;;  %v568_v47 = vcombine.high %v546_v30, %v546_v30  ;;  %p1457_p13 = pneg %p1456_p12  ;;  %p1462_p5 = scmp.lt.s32.totalorder %s1460_s11, %s1454_s23 }
  0x7c   : > { %v591_v36 = vrot.slane %v553_v32, %v1865_v31  ;;  %v1869_v38 = vrot.slane %v539_v34, %v529_v26  ;;  %v569_v63 = vcombine.high %v553_v32, %v553_v32 }
  0x7d   : > { %1269 = vmatmul.mubr.msk.f32.gmra.mxu0 %vm327_vm0, %v1807_v10  ;;  %1281 = vmatmul.mubr.msk.f32.gmra.mxu1 %vm327_vm0, %v1812_v11  ;;  %v579_v43 = vrot.slane %v560_v37, %v1865_v31  ;;  %v583_v62 = vrot.slane %v568_v47, %v1865_v31  ;;  %p1463_p2 = por %p1462_p5, %p1461_p0 }
  0x7e   : > { %1271 = vmatprep.mubr.msk.f32.mxu0 %vm327_vm0, %v1815_v12  ;;  %1283 = vmatprep.mubr.msk.f32.mxu1 %vm327_vm0, %v1818_v13  ;;  %v595_v44 = vrot.slane %v1869_v38, %v1865_v31  ;;  %v599_v30 = vrot.slane %v569_v63, %v1865_v31 }
  0x7f   : > { %p1464_p10 = pnand %p1463_p2, %p1457_p13 }
  0x81   : > { %1272 = vmatmul.mubr.msk.f32.gmra.mxu0 %vm327_vm0, %v1827_v14  ;;  %1284 = vmatmul.mubr.msk.f32.gmra.mxu1 %vm327_vm0, %v1832_v15 }
  0x82   : > { %1274 = vmatprep.mubr.msk.f32.mxu0 %vm327_vm0, %v1835_v16  ;;  %1286 = vmatprep.mubr.msk.f32.mxu1 %vm327_vm0, %v1838_v17 }
  0x85   : > { %1275 = vmatmul.mubr.msk.f32.gmra.mxu0 %vm327_vm0, %v1847_v18  ;;  %1287 = vmatmul.mubr.msk.f32.gmra.mxu1 %vm327_vm0, %v1852_v19 }
 0x139   : > { %v1267_v39 = vpop.f32.mrf.mxu0  ;;  %v1279_v40 = vpop.f32.mrf.mxu1 }
 0x13a   : > { %v613_v41 = vadd.f32 %v1267_v39, %v575_v35  ;;  %v621_v42 = vadd.f32 %v1279_v40, %v591_v36 }
 0x13b   : > { %v442_v45 = vpop.f32.mrf.mxu0  ;;  %v482_v46 = vpop.f32.mrf.mxu1 }
 0x13c   : > { %v629_v48 = vmax.f32 %v613_v41, 0.0  ;;  %v637_v49 = vmax.f32 %v621_v42, 0.0  ;;  %v612_v50 = vadd.f32 %v575_v35, %v442_v45  ;;  %v620_v51 = vadd.f32 %v591_v36, %v482_v46 }
 0x13d   : > { %v1270_v53 = vpop.f32.mrf.mxu0  ;;  %v1282_v54 = vpop.f32.mrf.mxu1  ;;  %v570_v36 = vcombine.high %v560_v37, %v560_v37  ;;  %v571_v46 = vcombine.high %v1869_v38, %v1869_v38 }
 0x13e   : > { %v628_v55 = vmax.f32 %v612_v50, 0.0  ;;  %v615_v56 = vadd.f32 %v1270_v53, %v579_v43  ;;  %v623_v57 = vadd.f32 %v1282_v54, %v595_v44  ;;  %v660_v59 = vmul.f32 %v1877_v52, %v637_v49 }
 0x13f   : > { %v452_v58 = vpop.f32.mrf.mxu0  ;;  %v492_v60 = vpop.f32.mrf.mxu1  ;;  %v652_v61 = vmul.f32 %v1877_v52, %v629_v48  ;;  %v636_v0 = vmax.f32 %v620_v51, 0.0  ;;  %v587_v50 = vrot.slane %v570_v36, %v1865_v31 }
 0x140   : > { %v631_v1 = vmax.f32 %v615_v56, 0.0  ;;  %v614_v2 = vadd.f32 %v579_v43, %v452_v58  ;;  %v639_v3 = vmax.f32 %v623_v57, 0.0  ;;  %v694_v20 = vsel %vm327_vm0, %v660_v59, 0.0 }
 0x141   : > { %v622_v21 = vadd.f32 %v595_v44, %v492_v60  ;;  %v670_v23 = vsel %vm327_vm0, %v652_v61, 0.0  ;;  %v651_v25 = vmul.f32 %v1877_v52, %v628_v55  ;;  %v1273_v26 = vpop.f32.mrf.mxu0  ;;  %v1285_v27 = vpop.f32.mrf.mxu1  ;;  %695 = vadd.xlane.f32.xlu1 %v694_v20  ;;  %v659_v35 = vmul.f32 %v1877_v52, %v636_v0 }
 0x142   : > { %671 = vadd.xlane.f32.xlu0 %v670_v23  ;;  %v654_v28 = vmul.f32 %v1877_v52, %v631_v1  ;;  %v662_v32 = vmul.f32 %v1877_v52, %v639_v3  ;;  %v617_v34 = vadd.f32 %v1273_v26, %v583_v62  ;;  %v630_v39 = vmax.f32 %v614_v2, 0.0 }
 0x143   : > { %v462_v29 = vpop.f32.mrf.mxu0  ;;  %v638_v40 = vmax.f32 %v622_v21, 0.0  ;;  %v667_v41 = vsel %vm327_vm0, %v651_v25, 0.0  ;;  %v502_v43 = vpop.f32.mrf.mxu1  ;;  %v625_v48 = vadd.f32 %v1285_v27, %v599_v30  ;;  %v691_v51 = vsel %vm327_vm0, %v659_v35, 0.0 }
 0x144   : > { %v676_v33 = vsel %vm327_vm0, %v654_v28, 0.0  ;;  %v616_v42 = vadd.f32 %v583_v62, %v462_v29  ;;  %v700_v45 = vsel %vm327_vm0, %v662_v32, 0.0  ;;  %v633_v47 = vmax.f32 %v617_v34, 0.0 }
 0x145   : > { %677 = vadd.xlane.f32.xlu1 %v676_v33  ;;  %v1276_v44 = vpop.f32.mrf.mxu0  ;;  %v624_v49 = vadd.f32 %v599_v30, %v502_v43  ;;  %v661_v53 = vmul.f32 %v1877_v52, %v638_v40  ;;  %v653_v54 = vmul.f32 %v1877_v52, %v630_v39  ;;  %v1288_v56 = vpop.f32.mrf.mxu1  ;;  %v603_v57 = vrot.slane %v571_v46, %v1865_v31 }
 0x146   : > { %668 = vadd.xlane.f32.xlu0 %v667_v41  ;;  %v632_v37 = vmax.f32 %v616_v42, 0.0  ;;  %v641_v58 = vmax.f32 %v625_v48, 0.0  ;;  %v619_v59 = vadd.f32 %v1276_v44, %v587_v50  ;;  %v656_v60 = vmul.f32 %v1877_v52, %v633_v47 }
 0x147   : > { %v472_v55 = vpop.f32.mrf.mxu0  ;;  %v640_v38 = vmax.f32 %v624_v49, 0.0  ;;  %v697_v61 = vsel %vm327_vm0, %v661_v53, 0.0  ;;  %v673_v62 = vsel %vm327_vm0, %v653_v54, 0.0  ;;  %v512_v1 = vpop.f32.mrf.mxu1  ;;  %v627_v3 = vadd.f32 %v1288_v56, %v603_v57 }
 0x148   : > { %v618_v63 = vadd.f32 %v587_v50, %v472_v55  ;;  %v655_v0 = vmul.f32 %v1877_v52, %v632_v37  ;;  %v635_v2 = vmax.f32 %v619_v59, 0.0  ;;  %v682_v20 = vsel %vm327_vm0, %v656_v60, 0.0 }
 0x149   : > { %701 = vadd.xlane.f32.xlu1 %v700_v45  ;;  %v664_v21 = vmul.f32 %v1877_v52, %v641_v58  ;;  %v626_v26 = vadd.f32 %v603_v57, %v512_v1  ;;  %v663_v27 = vmul.f32 %v1877_v52, %v640_v38  ;;  %v643_v28 = vmax.f32 %v627_v3, 0.0 }
 0x14a   : > { %692 = vadd.xlane.f32.xlu0 %v691_v51  ;;  %v634_v23 = vmax.f32 %v618_v63, 0.0  ;;  %v679_v25 = vsel %vm327_vm0, %v655_v0, 0.0  ;;  %v658_v33 = vmul.f32 %v1877_v52, %v635_v2  ;;  %v716_v49 = vand.u32 127, %v527_v22 }
 0x14b   : > { %v706_v29 = vsel %vm327_vm0, %v664_v21, 0.0  ;;  %v642_v30 = vmax.f32 %v626_v26, 0.0  ;;  %v703_v32 = vsel %vm327_vm0, %v663_v27, 0.0  ;;  %v666_v39 = vmul.f32 %v1877_v52, %v643_v28 }
 0x14c   : > { %v657_v34 = vmul.f32 %v1877_v52, %v634_v23  ;;  %v688_v35 = vsel %vm327_vm0, %v658_v33, 0.0  ;;  %v738_v51 = vadd.s32 4294967288, %v716_v49  ;;  %v736_v54 = vsub.s32 %v716_v49, %v1859_v24 }
 0x14d   : > { %674 = vadd.xlane.f32.xlu1 %v673_v62  ;;  %v665_v40 = vmul.f32 %v1877_v52, %v642_v30  ;;  %v712_v41 = vsel %vm327_vm0, %v666_v39, 0.0  ;;  %vm717_vm9 = vcmp.lt.s32.totalorder %v716_v49, 12 }
 0x14e   : > { %698 = vadd.xlane.f32.xlu0 %v697_v61  ;;  %v685_v36 = vsel %vm327_vm0, %v657_v34, 0.0  ;;  %v741_v55 = vsub.s32 %v738_v51, %v1859_v24 }
 0x14f   : > { %v709_v42 = vsel %vm327_vm0, %v665_v40, 0.0 }
 0x151   : > { %683 = vadd.xlane.f32.xlu1 %v682_v20 }
 0x152   : > { %680 = vadd.xlane.f32.xlu0 %v679_v25 }
 0x155   : > { %707 = vadd.xlane.f32.xlu1 %v706_v29 }
 0x156   : > { %704 = vadd.xlane.f32.xlu0 %v703_v32 }
 0x159   : > { %689 = vadd.xlane.f32.xlu1 %v688_v35 }
 0x15a   : > { %686 = vadd.xlane.f32.xlu0 %v685_v36 }
 0x15d   : > { %713 = vadd.xlane.f32.xlu1 %v712_v41 }
 0x15e   : > { %710 = vadd.xlane.f32.xlu0 %v709_v42 }
 0x1ca   : > { %v696_v43 = vpop.xlane.xlu1 %695 }
 0x1cb   : > { %v672_v44 = vpop.xlane.xlu0 %671  ;;  %v779_v25 = vrot.slane %v696_v43, %v741_v55 }
 0x1cc   : > { %v742_v62 = vrot.slane %v672_v44, %v741_v55 }
 0x1ce   : > { %v678_v46 = vpop.xlane.xlu1 %677 }
 0x1cf   : > { %v669_v45 = vpop.xlane.xlu0 %668  ;;  %v752_v61 = vrot.slane %v678_v46, %v741_v55 }
 0x1d0   : > { %v737_v60 = vrot.slane %v669_v45, %v736_v54 }
 0x1d2   : > { %v702_v48 = vpop.xlane.xlu1 %701  ;;  %v744_v3 = vsel %vm743_vm1, %v742_v62, %v737_v60 }
 0x1d3   : > { %v693_v47 = vpop.xlane.xlu0 %692  ;;  %v788_v29 = vrot.slane %v702_v48, %v741_v55 }
 0x1d4   : > { %v775_v63 = vrot.slane %v693_v47, %v736_v54 }
 0x1d6   : > { %v675_v37 = vpop.xlane.xlu1 %674  ;;  %v780_v33 = vsel %vm743_vm1, %v779_v25, %v775_v63  ;;  %v893_v63 = vsub.s32 5, %v1859_v24 }
 0x1d7   : > { %v699_v50 = vpop.xlane.xlu0 %698  ;;  %v748_v56 = vrot.slane %v675_v37, %v736_v54 }
 0x1d8   : > { %v784_v20 = vrot.slane %v699_v50, %v736_v54 }
 0x1d9   : > { %v753_v22 = vsel %vm743_vm1, %v752_v61, %v748_v56  ;;  %v871_v61 = vsub.s32 3, %v1859_v24 }
 0x1da   : > { %v684_v52 = vpop.xlane.xlu1 %683  ;;  %v809_v26 = vsel %vm808_vm2, %v753_v22, %v744_v3  ;;  %v789_v39 = vsel %vm743_vm1, %v788_v29, %v784_v20  ;;  %v882_v22 = vsub.s32 4, %v1859_v24  ;;  %v915_v3 = vsub.s32 7, %v1859_v24 }
 0x1db   : > { %v681_v53 = vpop.xlane.xlu0 %680  ;;  %v761_v57 = vrot.slane %v684_v52, %v741_v55 }
 0x1dc   : > { %v757_v58 = vrot.slane %v681_v53, %v736_v54 }
 0x1de   : > { %v708_v38 = vpop.xlane.xlu1 %707  ;;  %v762_v0 = vsel %vm743_vm1, %v761_v57, %v757_v58  ;;  %v849_v58 = vsub.s32 1, %v1859_v24 }
 0x1df   : > { %v705_v59 = vpop.xlane.xlu0 %704  ;;  %v797_v27 = vrot.slane %v708_v38, %v741_v55  ;;  %v811_v30 = vsel %vm810_vm3, %v762_v0, %v809_v26  ;;  %v860_v38 = vsub.s32 2, %v1859_v24 }
 0x1e0   : > { %v793_v28 = vrot.slane %v705_v59, %v736_v54 }
 0x1e2   : > { %v690_v1 = vpop.xlane.xlu1 %689  ;;  %v798_v43 = vsel %vm743_vm1, %v797_v27, %v793_v28 }
 0x1e3   : > { %v687_v2 = vpop.xlane.xlu0 %686  ;;  %v770_v21 = vrot.slane %v690_v1, %v741_v55  ;;  %v904_v1 = vsub.s32 6, %v1859_v24 }
 0x1e4   : > { %v766_v23 = vrot.slane %v687_v2, %v736_v54 }
 0x1e6   : > { %v771_v32 = vsel %vm743_vm1, %v770_v21, %v766_v23  ;;  %v714_v35 = vpop.xlane.xlu1 %713 }
 0x1e7   : > { %v813_v34 = vsel %vm812_vm4, %v771_v32, %v811_v30  ;;  %v711_v36 = vpop.xlane.xlu0 %710  ;;  %v806_v40 = vrot.slane %v714_v35, %v741_v55 }
 0x1e8   : > { %v802_v41 = vrot.slane %v711_v36, %v736_v54  ;;  %v815_v42 = vsel %vm814_vm5, %v780_v33, %v813_v34 }
 0x1e9   : > { %v817_v44 = vsel %vm816_vm6, %v789_v39, %v815_v42 }
 0x1ea   : > { %v807_v45 = vsel %vm743_vm1, %v806_v40, %v802_v41  ;;  %v819_v46 = vsel %vm818_vm7, %v798_v43, %v817_v44 }
 0x1eb   : > { %v821_v47 = vsel %vm820_vm8, %v807_v45, %v819_v46 }
 0x1ec   : > { %v823_v48 = vsel %vm717_vm9, %v821_v47, -1e+30 }
 0x1ed   : > { %v825_v50 = vsel %vm824_vm10, %v823_v48, -inf }
 0x1ee   : > { %826 = vmax.xlane.f32.xlu0 %v825_v50 }
 0x277   : > { %v827_v37 = vpop.xlane.xlu0 %826 }
 0x278   : > { %v828_v51 = vsub.f32 %v823_v48, %v827_v37 }
 0x27a   : > { %v829_v52 = vmul.f32 1.442695, %v828_v51 }
 0x27c   : > { %1368 = vpow2.f32 %v829_v52 }
 0x289   : > { %v1369_v49 = vpop.eup %1368 }
 0x28a   : > { %v831_v53 = vsel %vm824_vm10, %v1369_v49, 0.0 }
 0x28b   : > { %832 = vadd.xlane.f32.xlu1 %v831_v53 }
 0x314   : > { %v833_v54 = vpop.xlane.xlu1 %832 }
 0x315   : > { %1370 = vrcp.f32 %v833_v54 }
 0x322   : > { %v1371_v55 = vpop.eup %1370 }
 0x323   : > { %v835_v56 = vmul.f32 %v1371_v55, %v1369_v49 }
 0x325   : > { %v839_v57 = vrot.slane %v835_v56, %v1865_v31  ;;  %1029 = vst.msk [vmem:[%s305_s9] sm:$0xff] %vm824_vm10, %v835_v56  ;;  %v850_v59 = vrot.slane %v835_v56, %v849_v58  ;;  %v861_v60 = vrot.slane %v835_v56, %v860_v38  ;;  %v872_v62 = vrot.slane %v835_v56, %v871_v61 }
 0x326   : > { %v883_v31 = vrot.slane %v835_v56, %v882_v22  ;;  %v894_v0 = vrot.slane %v835_v56, %v893_v63  ;;  %v905_v2 = vrot.slane %v835_v56, %v904_v1  ;;  %v916_v20 = vrot.slane %v835_v56, %v915_v3 }
 0x327   : > { %845 = vbcast.lane.b32.xlu1 %v839_v57, 264  ;;  %841 = vbcast.lane.b32.xlu0 %v839_v57, 256 }
 0x32b   : > { %852 = vbcast.lane.b32.xlu1 %v850_v59, 256  ;;  %863 = vbcast.lane.b32.xlu0 %v861_v60, 256 }
 0x32f   : > { %856 = vbcast.lane.b32.xlu1 %v850_v59, 264  ;;  %874 = vbcast.lane.b32.xlu0 %v872_v62, 256 }
 0x333   : > { %867 = vbcast.lane.b32.xlu1 %v861_v60, 264  ;;  %885 = vbcast.lane.b32.xlu0 %v883_v31, 256 }
 0x337   : > { %878 = vbcast.lane.b32.xlu1 %v872_v62, 264  ;;  %896 = vbcast.lane.b32.xlu0 %v894_v0, 256 }
 0x33b   : > { %889 = vbcast.lane.b32.xlu1 %v883_v31, 264  ;;  %907 = vbcast.lane.b32.xlu0 %v905_v2, 256 }
 0x33f   : > { %900 = vbcast.lane.b32.xlu1 %v894_v0, 264  ;;  %918 = vbcast.lane.b32.xlu0 %v916_v20, 256 }
 0x343   : > { %911 = vbcast.lane.b32.xlu1 %v905_v2, 264 }
 0x347   : > { %922 = vbcast.lane.b32.xlu1 %v916_v20, 264 }
 0x348   : > { %1467 = shalt.err (!%p1464_p10)
}
 0x349   : > { %s1468_s16 = scalar_lea.hbm %s1060_s6, 128  ;;  %s1472_s29 = scalar_lea.hbm %s2058_s5, 256 }
 0x34a   : > { %p1469_p1 = scmp.ne.s32.totalorder %s1060_s6, %s1468_s16  ;;  %p1473_p7 = scmp.lt.s32.totalorder %s1060_s6, %s2058_s5 }
 0x34b   : > { %p1474_p8 = scmp.lt.s32.totalorder %s1472_s29, %s1468_s16 }
 0x34c   : > { %p1470_p4 = pnand %p1469_p1, %p2081_p9 }
 0x34d   : > { %p1475_p11 = por %p1474_p8, %p1473_p7 }
 0x34e   : > { %p1471_p6 = pneg %p1470_p4 }
 0x350   : > { %p1476_p3 = pnand %p1475_p11, %p1471_p6 }
 0x352   : > { %1479 = shalt.err (!%p1476_p3)
}
 0x353   : > { %1306 = dma.vmem_to_hbm [thread:$0]  (%p2081_p9), %s1063_s12, 128, %s1060_s6, %s1036_s0  }
 0x354   : > { %s298_s9 = scalar_lea.vmem [#allocation8], %s1767_s26  ;;  %s2014_s12 = scalar_lea.hbm %s2057_s4, %s1231_s10 }
 0x355   : > { %s1049_s15 = sshll.u32 %s298_s9, 4  ;;  %s1031_s26 = scalar_lea.sflag [#allocation4], %s1755_s13  ;;  %s1050_s15 = int_to_ptr.vmem [resolvable:$true] %s1049_s15 }
 0x356   : > { %s1480_s0 = scalar_lea.vmem %s1050_s15, 128  ;;  %s1565_s23 = smov [#allocation8]  }
 0x357   : > { %p1481_p12 = scmp.ne.s32.totalorder %s1050_s15, %s1480_s0  ;;  %s1484_s27 = sshll.u32 %s1565_s23, 4  ;;  %s1485_s27 = int_to_ptr.vmem [resolvable:$false] %s1484_s27 }
 0x358   : > { %s1486_s22 = scalar_lea.vmem %s1485_s27, 256  ;;  %p1487_p5 = scmp.lt.s32.totalorder %s1050_s15, %s1485_s27 }
 0x359   : > { %p1482_p13 = pnand %p1481_p12, %p2081_p9  ;;  %p1488_p2 = scmp.lt.s32.totalorder %s1486_s22, %s1480_s0 }
 0x35b   : > { %p1483_p0 = pneg %p1482_p13  ;;  %p1489_p10 = por %p1488_p2, %p1487_p5 }
 0x35d   : > { %p1490_p1 = pnand %p1489_p10, %p1483_p0 }
 0x399   : > { %v846_v24 = vpop.permute.xlu1 %845  ;;  %v842_v21 = vpop.permute.xlu0 %841 }
 0x39a   : > { %v925_v29 = vmul.f32 %v846_v24, %v1785_v6  ;;  %v924_v30 = vmul.f32 %v842_v21, %v1779_v4 }
 0x39c   : > { %v941_v40 = vsel %vm327_vm0, %v925_v29, 0.0  ;;  %v940_v41 = vsel %vm327_vm0, %v924_v30, 0.0 }
 0x39d   : > { %v853_v23 = vpop.permute.xlu1 %852  ;;  %v864_v25 = vpop.permute.xlu0 %863  ;;  %v942_v46 = vadd.f32 %v941_v40, %v940_v41 }
 0x39e   : > { %v926_v32 = vmul.f32 %v853_v23, %v1791_v8  ;;  %v928_v33 = vmul.f32 %v864_v25, %v1815_v12 }
 0x39f   : > { %v943_v49 = vrot.slane %v942_v46, 4 }
 0x3a0   : > { %v958_v8 = vsel %vm327_vm0, %v928_v33, 0.0 }
 0x3a1   : > { %v857_v26 = vpop.permute.xlu1 %856  ;;  %v875_v27 = vpop.permute.xlu0 %874  ;;  %v944_v60 = vadd.f32 %v943_v49, %v942_v46 }
 0x3a2   : > { %v927_v28 = vmul.f32 %v857_v26, %v1807_v10  ;;  %v949_v10 = vsel %vm327_vm0, %v926_v32, 0.0  ;;  %v930_v6 = vmul.f32 %v875_v27, %v1835_v16 }
 0x3a3   : > { %v945_v24 = vrot.slane %v944_v60, 2 }
 0x3a4   : > { %v950_v36 = vsel %vm327_vm0, %v927_v28, 0.0 }
 0x3a5   : > { %v868_v34 = vpop.permute.xlu1 %867  ;;  %v886_v35 = vpop.permute.xlu0 %885  ;;  %v951_v42 = vadd.f32 %v950_v36, %v949_v10 }
 0x3a6   : > { %v929_v39 = vmul.f32 %v868_v34, %v1827_v14  ;;  %v967_v14 = vsel %vm327_vm0, %v930_v6, 0.0  ;;  %v932_v47 = vmul.f32 %v886_v35, %v1782_v5  ;;  %v946_v34 = vadd.f32 %v945_v24, %v944_v60 }
 0x3a7   : > { %v952_v50 = vrot.slane %v951_v42, 4 }
 0x3a8   : > { %v959_v4 = vsel %vm327_vm0, %v929_v39, 0.0  ;;  %v976_v55 = vsel %vm327_vm0, %v932_v47, 0.0 }
 0x3a9   : > { %v879_v12 = vpop.permute.xlu1 %878  ;;  %v897_v43 = vpop.permute.xlu0 %896  ;;  %v960_v44 = vadd.f32 %v959_v4, %v958_v8  ;;  %v953_v57 = vadd.f32 %v952_v50, %v951_v42  ;;  %v947_v42 = vrot.slane %v946_v34, 1 }
 0x3aa   : > { %v931_v45 = vmul.f32 %v879_v12, %v1847_v18  ;;  %v934_v18 = vmul.f32 %v897_v43, %v1794_v9 }
 0x3ab   : > { %v961_v51 = vrot.slane %v960_v44, 4  ;;  %v954_v63 = vrot.slane %v953_v57, 2  ;;  %v948_v50 = vadd.f32 %v947_v42, %v946_v34 }
 0x3ac   : > { %v968_v48 = vsel %vm327_vm0, %v931_v45, 0.0 }
 0x3ad   : > { %v969_v37 = vadd.f32 %v968_v48, %v967_v14  ;;  %v890_v16 = vpop.permute.xlu1 %889  ;;  %v908_v54 = vpop.permute.xlu0 %907  ;;  %v962_v38 = vadd.f32 %v961_v51, %v960_v44  ;;  %v955_v27 = vadd.f32 %v954_v63, %v953_v57 }
 0x3ae   : > { %v933_v52 = vmul.f32 %v890_v16, %v1788_v7  ;;  %v985_v7 = vsel %vm327_vm0, %v934_v18, 0.0  ;;  %v936_v22 = vmul.f32 %v908_v54, %v1818_v13 }
 0x3af   : > { %v970_v53 = vrot.slane %v969_v37, 4  ;;  %v963_v3 = vrot.slane %v962_v38, 2  ;;  %v956_v10 = vrot.slane %v955_v27, 1 }
 0x3b0   : > { %v977_v56 = vsel %vm327_vm0, %v933_v52, 0.0  ;;  %v994_v25 = vsel %vm327_vm0, %v936_v22, 0.0 }
 0x3b1   : > { %v978_v58 = vadd.f32 %v977_v56, %v976_v55  ;;  %v901_v5 = vpop.permute.xlu1 %900  ;;  %v971_v61 = vadd.f32 %v970_v53, %v969_v37  ;;  %v919_v1 = vpop.permute.xlu0 %918  ;;  %v964_v32 = vadd.f32 %v963_v3, %v962_v38 }
 0x3b2   : > { %v935_v59 = vmul.f32 %v901_v5, %v1812_v11  ;;  %v938_v26 = vmul.f32 %v919_v1, %v1838_v17 }
 0x3b3   : > { %v979_v62 = vrot.slane %v978_v58, 4  ;;  %v972_v21 = vrot.slane %v971_v61, 2  ;;  %v965_v8 = vrot.slane %v964_v32, 1 }
 0x3b4   : > { %v986_v31 = vsel %vm327_vm0, %v935_v59, 0.0  ;;  %v1003_v40 = vsel %vm327_vm0, %v938_v26, 0.0 }
 0x3b5   : > { %v980_v0 = vadd.f32 %v979_v62, %v978_v58  ;;  %v987_v9 = vadd.f32 %v986_v31, %v985_v7  ;;  %v912_v2 = vpop.permute.xlu1 %911  ;;  %v973_v35 = vadd.f32 %v972_v21, %v971_v61  ;;  %v966_v48 = vadd.f32 %v965_v8, %v964_v32 }
 0x3b6   : > { %v937_v20 = vmul.f32 %v912_v2, %v1832_v15 }
 0x3b7   : > { %v988_v11 = vrot.slane %v987_v9, 4  ;;  %v981_v23 = vrot.slane %v980_v0, 2  ;;  %v974_v12 = vrot.slane %v973_v35, 1 }
 0x3b8   : > { %v995_v13 = vsel %vm327_vm0, %v937_v20, 0.0 }
 0x3b9   : > { %v989_v28 = vadd.f32 %v988_v11, %v987_v9  ;;  %v996_v29 = vadd.f32 %v995_v13, %v994_v25  ;;  %v923_v30 = vpop.permute.xlu1 %922  ;;  %v982_v39 = vadd.f32 %v981_v23, %v980_v0  ;;  %v975_v37 = vadd.f32 %v974_v12, %v973_v35 }
 0x3ba   : > { %v939_v33 = vmul.f32 %v923_v30, %v1852_v19  ;;  %v957_v19 = vadd.f32 %v956_v10, %v955_v27 }
 0x3bb   : > { %v990_v15 = vrot.slane %v989_v28, 2  ;;  %v997_v36 = vrot.slane %v996_v29, 4  ;;  %v983_v45 = vrot.slane %v982_v39, 1 }
 0x3bc   : > { %v1004_v41 = vsel %vm327_vm0, %v939_v33, 0.0  ;;  %v1020_v49 = vsel %vm808_vm2, %v957_v19, %v948_v50 }
 0x3bd   : > { %v991_v17 = vadd.f32 %v990_v15, %v989_v28  ;;  %v998_v6 = vadd.f32 %v997_v36, %v996_v29  ;;  %v1005_v4 = vadd.f32 %v1004_v41, %v1003_v40  ;;  %v984_v52 = vadd.f32 %v983_v45, %v982_v39 }
 0x3be   : > { %v1021_v55 = vsel %vm810_vm3, %v966_v48, %v1020_v49 }
 0x3bf   : > { %v999_v43 = vrot.slane %v998_v6, 2  ;;  %v1006_v44 = vrot.slane %v1005_v4, 4  ;;  %v992_v46 = vrot.slane %v991_v17, 1  ;;  %v1022_v56 = vsel %vm812_vm4, %v975_v37, %v1021_v55 }
 0x3c0   : > { %v1023_v58 = vsel %vm814_vm5, %v984_v52, %v1022_v56 }
 0x3c1   : > { %v1000_v14 = vadd.f32 %v999_v43, %v998_v6  ;;  %v1007_v47 = vadd.f32 %v1006_v44, %v1005_v4  ;;  %v993_v53 = vadd.f32 %v992_v46, %v991_v17 }
 0x3c3   : > { %v1001_v16 = vrot.slane %v1000_v14, 1  ;;  %v1008_v51 = vrot.slane %v1007_v47, 2  ;;  %v1024_v5 = vsel %vm816_vm6, %v993_v53, %v1023_v58 }
 0x3c5   : > { %v1009_v54 = vadd.f32 %v1008_v51, %v1007_v47  ;;  %v1002_v18 = vadd.f32 %v1001_v16, %v1000_v14 }
 0x3c7   : > { %v1010_v57 = vrot.slane %v1009_v54, 1  ;;  %v1025_v59 = vsel %vm818_vm7, %v1002_v18, %v1024_v5 }
 0x3c9   : > { %v1011_v38 = vadd.f32 %v1010_v57, %v1009_v54 }
 0x3cb   : > { %v1026_v60 = vsel %vm820_vm8, %v1011_v38, %v1025_v59 }
 0x3cc   : > { %1028 = vst.msk [vmem:[%s298_s9] sm:$0xff] %vm327_vm0, %v1026_v60 }
 0x3cd   : > { %1493 = shalt.err (!%p1490_p1)
}
 0x3ce   : > { %s1494_s10 = scalar_lea.hbm %s2014_s12, 128  ;;  %s1498_s11 = scalar_lea.hbm %s2057_s4, 256 }
 0x3cf   : > { %p1495_p4 = scmp.ne.s32.totalorder %s2014_s12, %s1494_s10  ;;  %p1499_p8 = scmp.lt.s32.totalorder %s2014_s12, %s2057_s4 }
 0x3d0   : > { %p1500_p11 = scmp.lt.s32.totalorder %s1498_s11, %s1494_s10 }
 0x3d1   : > { %p1496_p6 = pnand %p1495_p4, %p2081_p9 }
 0x3d2   : > { %p1501_p3 = por %p1500_p11, %p1499_p8 }
 0x3d3   : > { %p1497_p7 = pneg %p1496_p6 }
 0x3d5   : > { %p1502_p12 = pnand %p1501_p3, %p1497_p7 }
 0x3d7   : > { %1505 = shalt.err (!%p1502_p12)
}
 0x3d8   : > { %1305 = dma.vmem_to_hbm [thread:$0]  (%p2081_p9), %s1050_s15, 128, %s2014_s12, %s1031_s26  }
 0x3d9 PF: > { %s1074_s7 = sand.u32 1, %s1544_s18   ;;  %p2082_p13 = scmp.ne.s32.totalorder %s2066_s25, 0 }
 0x3da   : > { %p2083_p0 = scmp.ge.s32.totalorder %s1556_s21, 2  ;;  %s1075_s29 = scalar_lea.sflag [#allocation4], %s1074_s7 }
 0x3dc   : > { %p1321_p5 = pnand %p2083_p0, %p2082_p13 }
 0x3de   : > { %p1322_p2 = pneg %p1321_p5 }
 0x3e0   : > { %1535 = dma.done.wait (%p1322_p2), %s1075_s29, 128  }
 0x3e1   : > { %1537 = vsyncadd (%p1322_p2), %s1075_s29, 4294967168  ;;  %s1084_s24 = scalar_lea.sflag [#allocation10], %s1074_s7 }
 0x3e2   : > { %1539 = dma.done.wait (%p1322_p2), %s1084_s24, 128  }
 0x3e3   : > { %1541 = vsyncadd (%p1322_p2), %s1084_s24, 4294967168  ;;  %s2084_s14 = sld [smem:[#allocation16_spill]]  ;;  %p25_p9 = scmp.ge.s32.totalorder %s1650_s30, 4  }
 0x3e4   : > { %s2085_s18 = smov %s1548_s19  ;;  %s2086_s19 = smov %s1552_s20 }
 0x3e5   : > { %s2088_s21 = smov %s1650_s30  ;;  %27 = sbr.rel (!%p25_p9) target bundleno = 12 (0xc), region = 115 }
 0x3e9   : > { %s2087_s20 = smov %s2084_s14 }
 0x3ea   :  { %1089 = vsyncpa [#allocation3], 1 }
 0x3eb   :  { %1091 = vsyncpa [#allocation3 + $0x1], 1 }
 0x3ec   :  { %1092 = vsyncpa [#allocation6], 1 }
 0x3ed   :  { %1094 = vsyncpa [#allocation6 + $0x1], 1 }
 0x3ee   :  { %1095 = vsyncpa [#allocation4], 1 }
 0x3ef   :  { %1097 = vsyncpa [#allocation4 + $0x1], 1 }
 0x3f0   :  { %1098 = vsyncpa [#allocation10], 1 }
 0x3f1   :  { %1100 = vsyncpa [#allocation10 + $0x1], 1 }

</bundles_post_ra>
